<compile_context>
chip_gen: v6e
topology: v6e:2x2x1
jax: 0.10.0
libtpu: 0.0.40
codegen_flags: <defaults>
</compile_context>

<pallas_src>
import functools

import jax
import jax.numpy as jnp
from jax.experimental import pallas as pl
from jax.experimental.pallas import tpu as pltpu


def _feat_emb_attn_kernel(x_ref, q_ref, z_ref, attn_ref):
    # x_ref   : (TB, S, D)  VMEM
    # q_ref   : (1, D)      VMEM (same block for every grid step)
    # z_ref   : (TB, D)     VMEM (dense store)
    # attn_ref: (TB, S)     VMEM (dense store)
    x = x_ref[...]                                     # (TB, S, D) f32
    d = x.shape[-1]

    # (x / d^0.25) . (q / d^0.25) == x . (q / sqrt(d)) -- fold both scales into q.
    q_scaled = q_ref[...] * (1.0 / (float(d) ** 0.5))  # (1, D)

    # attention logits: elementwise mul + lane (D) reduce -> (TB, S)
    w = jnp.sum(x * q_scaled[:, None, :], axis=-1)

    # softmax over the sequence dim (PyTorch: Softmax(dim=1) on (B, S))
    m = jnp.max(w, axis=-1, keepdims=True)             # (TB, 1)
    e = jnp.exp(w - m)                                  # (TB, S)
    denom = jnp.sum(e, axis=-1, keepdims=True)          # (TB, 1)
    inv = 1.0 / denom                                    # TB exact divides
    p = e * inv                                          # (TB, S)

    attn_ref[...] = p

    # weighted feature sum: VPU multiply + sublane (S) reduce -> (TB, D)
    z_ref[...] = jnp.sum(p[:, :, None] * x, axis=1)

    # TODO(synk): optional `mask` argument (masked_fill + renormalize) not implemented.


def _choose_tb(B, S, D, budget_bytes=4 * 1024 * 1024):
    """Batch rows per grid step, sized so a double-buffered x block stays small
    enough for every generation's default scoped VMEM (v5e 16 MiB .. v7x 32 MiB)."""
    per_row_bytes = max(S * D * 4, 1)
    tb = budget_bytes // per_row_bytes
    if tb >= B:
        # Single block covering the full batch extent (no sublane-divisibility
        # requirement when the block dim equals the full array dim).
        return B
    # Otherwise the (TB, D)/(TB, S) output blocks need TB % 8 == 0.
    # TODO(synk): rows with S*D*4 > budget would additionally need S-tiling.
    return max(8, (tb // 8) * 8)


@functools.partial(jax.jit, static_argnames=())
def feature_emb_attention(x, queryv):
    """x: (B, S, D) f32, queryv: (D,) f32 -> (z: (B, D), attn: (B, S))."""
    B, S, D = x.shape
    q2d = queryv.reshape(1, D).astype(jnp.float32)
    x = x.astype(jnp.float32)

    tb = _choose_tb(B, S, D)
    pad = (-B) % tb
    if pad:
        x_in = jnp.concatenate([x, jnp.zeros((pad, S, D), x.dtype)], axis=0)
    else:
        x_in = x
    Bp = B + pad
    num_blocks = Bp // tb

    cost = pl.CostEstimate(
        flops=4 * Bp * S * D,                       # logits + weighted sum
        transcendentals=Bp * S,                     # exp
        bytes_accessed=4 * (Bp * S * D + D + Bp * D + Bp * S),
    )

    z, attn = pl.pallas_call(
        _feat_emb_attn_kernel,
        out_shape=(
            jax.ShapeDtypeStruct((Bp, D), jnp.float32),
            jax.ShapeDtypeStruct((Bp, S), jnp.float32),
        ),
        grid_spec=pltpu.PrefetchScalarGridSpec(
            num_scalar_prefetch=0,
            grid=(num_blocks,),
            in_specs=[
                pl.BlockSpec((tb, S, D), lambda b: (b, 0, 0)),
                pl.BlockSpec((1, D), lambda b: (0, 0)),
            ],
            out_specs=[
                pl.BlockSpec((tb, D), lambda b: (b, 0)),
                pl.BlockSpec((tb, S), lambda b: (b, 0)),
            ],
        ),
        compiler_params=pltpu.CompilerParams(
            dimension_semantics=("parallel",),      # megacore-shardable on v7x
        ),
        cost_estimate=cost,
    )(x_in, q2d)

    if pad:
        z = z[:B]
        attn = attn[:B]
    return z, attn


def _reference(x, queryv):
    d = x.shape[-1]
    x_s = x / (d ** 0.25)
    q_s = queryv / (d ** 0.25)
    w = jnp.einsum("bsd,d->bs", x_s, q_s)
    p = jax.nn.softmax(w, axis=1)
    z = jnp.einsum("bs,bsd->bd", p, x)
    return z, p


if __name__ == "__main__":
    B, S, D = 2, 8, 32
    key = jax.random.PRNGKey(0)
    kx, kq = jax.random.split(key)
    x = jax.random.normal(kx, (B, S, D), dtype=jnp.float32)
    # deterministic parameter init (stands in for torch.randn(input_dim))
    queryv = jax.random.normal(kq, (D,), dtype=jnp.float32)

    z, attn = feature_emb_attention(x, queryv)
    jax.block_until_ready((z, attn))

    z_ref, attn_ref = _reference(x, queryv)
    assert z.shape == (B, D) and attn.shape == (B, S)
    assert jnp.allclose(z, z_ref, atol=1e-5, rtol=1e-5)
    assert jnp.allclose(attn, attn_ref, atol=1e-5, rtol=1e-5)

    print("KERNEL_OK")
</pallas_src>

<mosaic_0001>
module attributes {stable_mosaic.version = 11 : i64} {
  func.func @_feat_emb_attn_kernel(%arg0: i32, %arg1: memref<2x8x32xf32, #tpu.memory_space<vmem>>, %arg2: memref<1x32xf32, #tpu.memory_space<vmem>>, %arg3: memref<2x32xf32, #tpu.memory_space<vmem>>, %arg4: memref<2x8xf32, #tpu.memory_space<vmem>>) attributes {dimension_semantics = [#tpu.dimension_semantics<parallel>], iteration_bounds = array<i64: 1>, scalar_prefetch = 0 : i64, scratch_operands = 0 : i64, tpu.core_type = #tpu.core_type<tc>, window_params = [{transform_indices = @transform_0, window_bounds = array<i64: 2, 8, 32>}, {pipeline_mode = #tpu.pipeline_mode<synchronous>, transform_indices = @transform_1, window_bounds = array<i64: 1, 32>}, {transform_indices = @transform_2, window_bounds = array<i64: 2, 32>}, {transform_indices = @transform_3, window_bounds = array<i64: 2, 8>}]} {
    %c0 = arith.constant 0 : index
    %c0_0 = arith.constant 0 : index
    %c0_1 = arith.constant 0 : index
    %0 = vector.load %arg1[%c0, %c0_0, %c0_1] : memref<2x8x32xf32, #tpu.memory_space<vmem>>, vector<2x8x32xf32>
    %c0_2 = arith.constant 0 : index
    %c0_3 = arith.constant 0 : index
    %1 = vector.load %arg2[%c0_2, %c0_3] : memref<1x32xf32, #tpu.memory_space<vmem>>, vector<1x32xf32>
    %cst = arith.constant 0.176776692 : f32
    %2 = vector.broadcast %cst : f32 to vector<1x32xf32>
    %3 = arith.mulf %1, %2 : vector<1x32xf32>
    %4 = vector.shape_cast %3 : vector<1x32xf32> to vector<1x1x32xf32>
    %5 = vector.broadcast %4 : vector<1x1x32xf32> to vector<2x8x32xf32>
    %6 = arith.mulf %0, %5 : vector<2x8x32xf32>
    %cst_4 = arith.constant dense<0.000000e+00> : vector<2x8xf32>
    %7 = vector.multi_reduction <add>, %6, %cst_4 [2] : vector<2x8x32xf32> to vector<2x8xf32>
    %cst_5 = arith.constant dense<0xFF800000> : vector<2xf32>
    %8 = vector.multi_reduction <maximumf>, %7, %cst_5 [1] : vector<2x8xf32> to vector<2xf32>
    %9 = vector.shape_cast %8 : vector<2xf32> to vector<2x1xf32>
    %10 = vector.broadcast %9 : vector<2x1xf32> to vector<2x8xf32>
    %11 = arith.subf %7, %10 : vector<2x8xf32>
    %12 = math.exp %11 : vector<2x8xf32>
    %cst_6 = arith.constant dense<0.000000e+00> : vector<2xf32>
    %13 = vector.multi_reduction <add>, %12, %cst_6 [1] : vector<2x8xf32> to vector<2xf32>
    %14 = vector.shape_cast %13 : vector<2xf32> to vector<2x1xf32>
    %cst_7 = arith.constant 1.000000e+00 : f32
    %15 = vector.broadcast %cst_7 : f32 to vector<2x1xf32>
    %16 = arith.divf %15, %14 : vector<2x1xf32>
    %17 = vector.broadcast %16 : vector<2x1xf32> to vector<2x8xf32>
    %18 = arith.mulf %12, %17 : vector<2x8xf32>
    %c0_8 = arith.constant 0 : index
    %c0_9 = arith.constant 0 : index
    %19 = vector.load %arg4[%c0_8, %c0_9] : memref<2x8xf32, #tpu.memory_space<vmem>>, vector<2x8xf32>
    tpu.vector_store %arg4[%c0_8, %c0_9], %18 {strides = array<i32>} : memref<2x8xf32, #tpu.memory_space<vmem>>, vector<2x8xf32>,
    %20 = vector.shape_cast %18 : vector<2x8xf32> to vector<2x8x1xf32>
    %21 = vector.broadcast %20 : vector<2x8x1xf32> to vector<2x8x32xf32>
    %22 = arith.mulf %21, %0 : vector<2x8x32xf32>
    %cst_10 = arith.constant dense<0.000000e+00> : vector<2x32xf32>
    %23 = vector.multi_reduction <add>, %22, %cst_10 [1] : vector<2x8x32xf32> to vector<2x32xf32>
    %c0_11 = arith.constant 0 : index
    %c0_12 = arith.constant 0 : index
    %24 = vector.load %arg3[%c0_11, %c0_12] : memref<2x32xf32, #tpu.memory_space<vmem>>, vector<2x32xf32>
    tpu.vector_store %arg3[%c0_11, %c0_12], %23 {strides = array<i32>} : memref<2x32xf32, #tpu.memory_space<vmem>>, vector<2x32xf32>,
    return
  }
  func.func @transform_0(%arg0: i32) -> (i32, i32, i32) {
    %c0_i32 = arith.constant 0 : i32
    %c0_i32_0 = arith.constant 0 : i32
    %c0_i32_1 = arith.constant 0 : i32
    return %arg0, %c0_i32, %c0_i32_0 : i32, i32, i32
  }
  func.func @transform_1(%arg0: i32) -> (i32, i32) {
    %c0_i32 = arith.constant 0 : i32
    %c0_i32_0 = arith.constant 0 : i32
    %c0_i32_1 = arith.constant 0 : i32
    return %c0_i32, %c0_i32_0 : i32, i32
  }
  func.func @transform_2(%arg0: i32) -> (i32, i32) {
    %c0_i32 = arith.constant 0 : i32
    %c0_i32_0 = arith.constant 0 : i32
    return %arg0, %c0_i32 : i32, i32
  }
  func.func @transform_3(%arg0: i32) -> (i32, i32) {
    %c0_i32 = arith.constant 0 : i32
    %c0_i32_0 = arith.constant 0 : i32
    return %arg0, %c0_i32 : i32, i32
  }
}

</mosaic_0001>

<bundles_post_ra>
// kernel: feature_emb_attention.1
= control target key start
LH: loop header
LB: loop body
LE: loop exit
PB: predicated region body
PF: predicated region fallthrough
CT: control target
= control target key end

     0   :  { %9 = vsyncpa [#allocation3], 0  ;;  %s329_s0 = inlined_call_operand.hbm [shape: f32[2,8,32], index: 0, kind: input, shape index: {}]   ;;  %s330_s1 = inlined_call_operand.vmem [shape: f32[1,32], index: 1, kind: input, shape index: {}]   ;;  %s331_s2 = inlined_call_operand.hbm [shape: f32[2,32], index: 2, kind: output, shape index: {0}]   ;;  %s332_s3 = inlined_call_operand.hbm [shape: f32[2,8], index: 3, kind: output, shape index: {1}]  }
   0x1   :  { %10 = vsyncpa [#allocation4], 0 }
   0x2   :  { %11 = vsyncpa [#allocation7], 0  ;;  %s272_s12 = smov [#allocation2]  }
   0x3   :  { %s17_s13 = sshll.u32 %s272_s12, 4  ;;  %s18_s13 = int_to_ptr.vmem [resolvable:$true] %s17_s13 }
   0x4   :  { %s214_s14 = scalar_lea.vmem %s18_s13, 256  ;;  %p219_p1 = scmp.lt.s32.totalorder %s18_s13, %s18_s13 }
   0x5   :  { %p215_p0 = scmp.ne.s32.totalorder %s18_s13, %s214_s14  ;;  %p220_p2 = scmp.lt.s32.totalorder %s214_s14, %s214_s14 }
   0x7   :  { %p221_p3 = por %p220_p2, %p219_p1 }
   0x9   :  { %p222_p4 = pnand %p221_p3, %p215_p0 }
   0xb   :  { %225 = shalt.err (!%p222_p4)
}
   0xc   :  { %s273_s15 = smov 128   ;;  %s274_s16 = smov 8  }
   0xd   :  { %23 = dma.hbm_to_vmem [thread:$0]  %s329_s0, 256, %s18_s13, [#allocation3], %s273_s15, %s273_s15, %s274_s16  }
   0xe   :  { %266 = dma.done.wait [#allocation3], 256  }
   0xf   :  { %267 = vsyncadd [#allocation3], 4294967040  ;;  %v34_v0 = vlaneseq  ;;  %v31_v5 = vld [vmem:[%s330_s1] sm:$0x1]  ;;  %v30_v8 = vld [vmem:[#allocation2 + $0x8] sm:$0xff]  ;;  %vm41_vm0 = vcmask 261120  }
  0x10   :  { %v32_v6 = vmul.f32 0.17677669, %v31_v5  ;;  %v29_v7 = vld [vmem:[#allocation2] sm:$0xff]  ;;  %vm60_vm1 = vcmask 1041409   ;;  %vm63_vm2 = vcmask 58368   ;;  %v275_v20 = vmov 0  }
  0x11   :  { %v35_v1 = vshrl.u32 %v34_v0, 7  ;;  %v51_v2 = vand.u32 127, %v34_v0  ;;  %199 = vset.pattern.permute.xlu0 %v275_v20  ;;  %198 = vset.pattern.permute.xlu1 %v275_v20  ;;  %s276_s0 = smov [#allocation6]  }
  0x12   :  { %s179_s1 = sshll.u32 %s276_s0, 4  ;;  %s180_s1 = int_to_ptr.vmem [resolvable:$true] %s179_s1 }
  0x13   :  { %v301_v3 = vsub.s32 %v51_v2, %v35_v1  ;;  %v36_v4 = vsub.s32 0, %v35_v1  ;;  %v74_v21 = vsub.s32 1, %v35_v1  ;;  %s226_s21 = scalar_lea.vmem %s180_s1, 32  ;;  %p231_p6 = scmp.lt.s32.totalorder %s180_s1, %s180_s1 }
  0x14   :  { %p227_p5 = scmp.ne.s32.totalorder %s180_s1, %s226_s21  ;;  %p232_p7 = scmp.lt.s32.totalorder %s226_s21, %s226_s21 }
  0x15   :  { %v37_v9 = vrot.slane %v32_v6, %v36_v4 }
  0x16   :  { %p233_p8 = por %p232_p7, %p231_p6 }
  0x17   :  { %v39_v10 = vmul.f32 %v37_v9, %v29_v7  ;;  %v40_v11 = vmul.f32 %v37_v9, %v30_v8 }
  0x18   :  { %p234_p9 = pnand %p233_p8, %p227_p5 }
  0x19   :  { %v42_v12 = vsel %vm41_vm0, %v39_v10, 0.0  ;;  %v45_v13 = vsel %vm41_vm0, %v40_v11, 0.0 }
  0x1a   :  { %43 = vadd.xlane.f32.xlu0 %v42_v12 }
  0x1e   :  { %46 = vadd.xlane.f32.xlu0 %v45_v13 }
  0xa3   :  { %v44_v14 = vpop.xlane.xlu0 %43 }
  0xa4   :  { %v55_v16 = vrot.slane %v44_v14, %v301_v3 }
  0xa7   :  { %v47_v15 = vpop.xlane.xlu0 %46 }
  0xa8   :  { %v59_v17 = vrot.slane %v47_v15, %v301_v3 }
  0xaa   :  { %v61_v18 = vsel %vm60_vm1, %v59_v17, %v55_v16 }
  0xab   :  { %v64_v19 = vsel %vm63_vm2, %v61_v18, -inf }
  0xac   :  { %65 = vmax.xlane.f32.xlu1 %v64_v19 }
 0x135   :  { %v66_v22 = vpop.xlane.xlu1 %65 }
 0x136   :  { %v71_v23 = vrot.slane %v66_v22, %v36_v4  ;;  %v75_v24 = vrot.slane %v66_v22, %v74_v21 }
 0x138   :  { %v78_v25 = vsub.f32 %v44_v14, %v71_v23  ;;  %v79_v26 = vsub.f32 %v47_v15, %v75_v24 }
 0x13a   :  { %v80_v27 = vmul.f32 1.442695, %v78_v25  ;;  %v82_v28 = vmul.f32 1.442695, %v79_v26 }
 0x13c   :  { %200 = vpow2.f32 %v80_v27 }
 0x13d   :  { %202 = vpow2.f32 %v82_v28 }
 0x149   :  { %v201_v29 = vpop.eup %200 }
 0x14a   :  { %v203_v30 = vpop.eup %202  ;;  %87 = vperm.xlu1 %198, %v201_v29  }
 0x14b   :  { %90 = vperm.xlu0 %199, %v203_v30  }
 0x1c5   :  { %v88_v31 = vpop.permute.xlu1 %87 }
 0x1c6   :  { %v91_v32 = vpop.permute.xlu0 %90  ;;  %v95_v33 = vrot.slane %v88_v31, %v301_v3 }
 0x1c7   :  { %v99_v34 = vrot.slane %v91_v32, %v301_v3 }
 0x1c9   :  { %v100_v35 = vsel %vm60_vm1, %v99_v34, %v95_v33 }
 0x1ca   :  { %v102_v36 = vsel %vm63_vm2, %v100_v35, 0.0 }
 0x1cb   :  { %103 = vadd.xlane.f32.xlu1 %v102_v36 }
 0x254   :  { %v104_v37 = vpop.xlane.xlu1 %103 }
 0x255   :  { %204 = vrcp.f32 %v104_v37 }
 0x262   :  { %v205_v38 = vpop.eup %204 }
 0x263   :  { %v111_v39 = vrot.slane %v205_v38, %v36_v4  ;;  %v115_v41 = vrot.slane %v205_v38, %v74_v21 }
 0x265   :  { %v118_v40 = vmul.f32 %v201_v29, %v111_v39  ;;  %v119_v42 = vmul.f32 %v203_v30, %v115_v41 }
 0x267   :  { %123 = vperm.xlu0 %199, %v118_v40  }
 0x26b   :  { %126 = vperm.xlu0 %199, %v119_v42  }
 0x2e2   :  { %v124_v43 = vpop.permute.xlu0 %123 }
 0x2e3   :  { %v141_v44 = vmul.f32 %v124_v43, %v29_v7  ;;  %v131_v48 = vrot.slane %v124_v43, %v301_v3 }
 0x2e5   :  { %v143_v45 = vsel %vm41_vm0, %v141_v44, 0.0 }
 0x2e6   :  { %v144_v46 = vrot.slane %v143_v45, 4  ;;  %v127_v47 = vpop.permute.xlu0 %126 }
 0x2e7   :  { %v135_v49 = vrot.slane %v127_v47, %v301_v3  ;;  %v142_v50 = vmul.f32 %v127_v47, %v30_v8 }
 0x2e8   :  { %v145_v51 = vadd.f32 %v144_v46, %v143_v45 }
 0x2e9   :  { %v150_v52 = vsel %vm41_vm0, %v142_v50, 0.0  ;;  %v136_v53 = vsel %vm60_vm1, %v135_v49, %v131_v48 }
 0x2ea   :  { %v146_v54 = vrot.slane %v145_v51, 2  ;;  %v151_v55 = vrot.slane %v150_v52, 4  ;;  %138 = vst.msk [vmem:[#allocation6] sm:$0x3] %vm63_vm2, %v136_v53 }
 0x2eb   :  { %237 = shalt.err (!%p234_p9)
}
 0x2ec   :  { %182 = dma.vmem_to_hbm [thread:$0]  %s180_s1, 32, %s332_s3, [#allocation7]   ;;  %v147_v56 = vadd.f32 %v146_v54, %v145_v51  ;;  %v152_v57 = vadd.f32 %v151_v55, %v150_v52  ;;  %vm161_vm3 = vcmask 254976  }
 0x2ed   :  { %s277_s24 = smov [#allocation5]  }
 0x2ee   :  { %v153_v58 = vrot.slane %v152_v57, 2  ;;  %v148_v59 = vrot.slane %v147_v56, 1  ;;  %s169_s25 = sshll.u32 %s277_s24, 4  ;;  %s170_s25 = int_to_ptr.vmem [resolvable:$true] %s169_s25 }
 0x2ef   :  { %s246_s26 = scalar_lea.vmem %s170_s25, 32  ;;  %p251_p11 = scmp.lt.s32.totalorder %s170_s25, %s170_s25 }
 0x2f0   :  { %v154_v60 = vadd.f32 %v153_v58, %v152_v57  ;;  %v149_v63 = vadd.f32 %v148_v59, %v147_v56  ;;  %p247_p10 = scmp.ne.s32.totalorder %s170_s25, %s246_s26  ;;  %p252_p12 = scmp.lt.s32.totalorder %s246_s26, %s246_s26 }
 0x2f2   :  { %v155_v61 = vrot.slane %v154_v60, 1  ;;  %p253_p13 = por %p252_p12, %p251_p11 }
 0x2f4   :  { %v156_v62 = vadd.f32 %v155_v61, %v154_v60  ;;  %p254_p0 = pnand %p253_p13, %p247_p10 }
 0x2f6   :  { %v159_v0 = vsel %vm60_vm1, %v156_v62, %v149_v63 }
 0x2f7   :  { %162 = vst.msk [vmem:[#allocation5] sm:$0x3] %vm161_vm3, %v159_v0 }
 0x2f8   :  { %257 = shalt.err (!%p254_p0)
}
 0x2f9   :  { %172 = dma.vmem_to_hbm [thread:$0]  %s170_s25, 32, %s331_s2, [#allocation4]  }
 0x2fa   :  { %268 = dma.done.wait [#allocation4], 32  }
 0x2fb   :  { %269 = vsyncadd [#allocation4], 4294967264 }
 0x2fc   :  { %270 = dma.done.wait [#allocation7], 32  }
 0x2fd   :  { %271 = vsyncadd [#allocation7], 4294967264 }
 0x2fe   :  { %189 = vsyncpa [#allocation3], 1 }
 0x2ff   :  { %190 = vsyncpa [#allocation4], 1 }
 0x300   :  { %191 = vsyncpa [#allocation7], 1 }

</bundles_post_ra>
